<compile_context>
chip_gen: v5e
topology: v5e:2x2
jax: 0.10.0
libtpu: 0.0.40
codegen_flags: <defaults>
</compile_context>

<pallas_src>
import functools
from math import sqrt

import jax
import jax.numpy as jnp
from jax import lax
from jax.experimental import pallas as pl
from jax.experimental.pallas import tpu as pltpu


def _round_up(x, m):
    return ((x + m - 1) // m) * m


def _device_caps():
    """(vmem_capacity_bytes, query-tile cap) for the local TPU generation."""
    vmem_bytes = 64 << 20  # conservative default (v7x physical per-TC VMEM)
    try:
        info = pltpu.get_tpu_info()
        vmem_bytes = int(getattr(info, "vmem_capacity_bytes", vmem_bytes))
    except Exception:
        pass
    kind = ""
    try:
        kind = jax.devices()[0].device_kind.lower()
    except Exception:
        pass
    # v5e (and older) MXUs are 128-wide: 128-row LHS tiles already saturate
    # them; v6e/v7x MXUs are 256-wide, so allow 256-row query tiles there.
    narrow_mxu = any(t in kind for t in ("v5 lite", "v5e", "v5litepod", "v4", "v3", "v2"))
    tq_cap = 128 if narrow_mxu else 256
    return vmem_bytes, tq_cap


def _sdpa_kernel(q_ref, k_ref, v_ref, out_ref, attn_ref, *, inv_temper):
    # Block shapes: q (1, TQ, Dh), k (1, Lk, Dh), v (1, Lk, Dv)
    q = q_ref[0]          # (TQ, Dh)
    k = k_ref[0]          # (Lk, Dh)
    v = v_ref[0]          # (Lk, Dv)

    # scores = q @ k^T, expressed as a contraction on dim 1 of both operands
    # (no materialized transpose of k); f32 accumulation on the MXU.
    # NOTE: default MXU precision; pin lax.Precision.HIGHEST if bit-tighter
    # f32 agreement with a pure-f32 reference is ever required.
    s = lax.dot_general(
        q, k,
        dimension_numbers=(((1,), (1,)), ((), ())),
        preferred_element_type=jnp.float32,
    )  # (TQ, Lk) f32

    # TODO(synk): training-mode dropout on the pre-softmax scores is omitted
    # (eval-mode / drop_prob=0 semantics => identity).

    # softmax((q @ k^T) / temper): fold the 1/temper scale into the exp
    # argument in f32 so bf16 inputs are not rounded an extra time.
    m = jnp.max(s, axis=-1, keepdims=True)
    e = jnp.exp((s - m) * inv_temper)
    denom = jnp.sum(e, axis=-1, keepdims=True)
    r = pl.reciprocal(denom, approx=True)   # EUP slot (nearly free)
    r = r * (2.0 - denom * r)               # one Newton step on TQ elements
    attn_f32 = e * r                        # (TQ, Lk) f32

    # Cast once; reuse for both the PV matmul and the attn store when the
    # dtypes line up (saves one (TQ, Lk) VPU cast pass per step).
    attn_lo = attn_f32.astype(v_ref.dtype)
    out = jnp.dot(attn_lo, v, preferred_element_type=jnp.float32)

    out_ref[0] = out.astype(out_ref.dtype)
    if attn_ref.dtype == attn_lo.dtype:
        attn_ref[0] = attn_lo
    else:
        attn_ref[0] = attn_f32.astype(attn_ref.dtype)


def scaled_dot_product_attention(q, k, v, d_h=None, drop_prob=0.0, attn_dtype=None):
    """Pallas TPU version of ScaledDotProductAttention.forward (eval mode).

    q: (B, Lq, d_h), k: (B, Lk, d_h), v: (B, Lk, d_v)
    returns (output (B, Lq, d_v), attn (B, Lq, Lk))
    attn_dtype: optional lower-precision dtype for the attn output (e.g.
      jnp.bfloat16) if downstream consumers tolerate it; default keeps the
      module's semantics (same dtype as q).
    """
    # Eval-mode semantics only: pre-softmax dropout would change results.
    assert drop_prob == 0.0, "training-mode dropout is not supported"

    B, Lq, Dh = q.shape
    Bk, Lk, Dh_k = k.shape
    Bv, Lkv, Dv = v.shape
    assert Dh == Dh_k and Bk == B and Bv == B and Lkv == Lk
    inv_temper = 1.0 / sqrt(float(Dh if d_h is None else d_h))
    attn_dtype = jnp.dtype(q.dtype) if attn_dtype is None else jnp.dtype(attn_dtype)

    # Generation-aware VMEM budget / query-tile cap.
    vmem_bytes, tq_cap = _device_caps()
    if vmem_bytes >= (128 << 20):        # v5e / v6e: use most of the 128 MiB
        budget, vmem_limit = 96 << 20, 100 << 20
    else:                                # v7x (64 MiB) or unknown: stay conservative
        budget, vmem_limit = 40 << 20, 48 << 20

    itm = jnp.dtype(q.dtype).itemsize
    attn_itm = attn_dtype.itemsize
    pack = max(8, 32 // itm)             # sublane pack: 8 f32, 16 bf16, 32 int8/fp8
    # VMEM layout rounds the last two dims up to the hardware tile internally;
    # use rounded sizes for the residency estimate only (no data padding).
    Dh_l, Dv_l, Lk_l = (_round_up(x, 128) for x in (Dh, Dv, Lk))

    tq = min(tq_cap, _round_up(Lq, pack))
    while tq > pack:
        tq_l = _round_up(tq, 8)
        resident = (
            2 * Lk_l * (Dh_l + Dv_l) * itm                             # K/V (2 pipeline bufs)
            + 2 * tq_l * (Dh_l * itm + Dv_l * itm + Lk_l * attn_itm)   # q / out / attn tiles
            + 4 * tq_l * Lk_l * 4                                      # f32 softmax temps + slack
        )
        if resident <= budget:
            break
        tq //= 2
    tq = max(tq, pack)
    if tq >= Lq:
        tq = Lq                          # single full-extent query block (always legal)
    # TODO(synk): for very long Lk on v7x (64 MiB VMEM) a flash-style
    # Lk-tiled online softmax would be the next structural change; the module
    # contract returns the full attn matrix, so K/V stay resident here.

    grid = (B, pl.cdiv(Lq, tq))
    # Prefer splitting megacore TensorCores over the batch axis: sharding the
    # inner query-tile axis would make each core re-DMA the same K/V block.
    dim_sem = ("parallel", "arbitrary") if B >= 2 else ("parallel", "parallel")

    cost = pl.CostEstimate(
        flops=2 * B * Lq * Lk * (Dh + Dv),
        transcendentals=B * Lq * Lk,
        bytes_accessed=(q.size + k.size + v.size) * itm
        + B * Lq * Dv * itm + B * Lq * Lk * attn_itm,
    )

    kernel = functools.partial(_sdpa_kernel, inv_temper=inv_temper)

    out, attn = pl.pallas_call(
        kernel,
        out_shape=(
            jax.ShapeDtypeStruct((B, Lq, Dv), q.dtype),
            jax.ShapeDtypeStruct((B, Lq, Lk), attn_dtype),
        ),
        grid_spec=pltpu.PrefetchScalarGridSpec(
            num_scalar_prefetch=0,
            grid=grid,
            in_specs=[
                pl.BlockSpec((1, tq, Dh), lambda b, i: (b, i, 0)),
                # K/V block index is invariant along the query-tile axis, so the
                # pipeline keeps the resident copy across i (no re-DMA).
                # TODO(synk): single-buffer K/V (pl.Buffered(1)) once pipeline_mode
                # on top-level BlockSpecs is universally supported; the budget
                # above conservatively counts the default 2 buffers.
                pl.BlockSpec((1, Lk, Dh), lambda b, i: (b, 0, 0)),
                pl.BlockSpec((1, Lk, Dv), lambda b, i: (b, 0, 0)),
            ],
            out_specs=[
                pl.BlockSpec((1, tq, Dv), lambda b, i: (b, i, 0)),
                pl.BlockSpec((1, tq, Lk), lambda b, i: (b, i, 0)),
            ],
        ),
        compiler_params=pltpu.CompilerParams(
            dimension_semantics=dim_sem,
            vmem_limit_bytes=vmem_limit,
        ),
        cost_estimate=cost,
    )(q, k, v)
    return out, attn


def _reference(q, k, v):
    temper = sqrt(q.shape[-1])
    scores = jnp.einsum("bqd,bkd->bqk", q, k) / temper
    attn = jax.nn.softmax(scores, axis=2)
    out = jnp.einsum("bqk,bkd->bqd", attn, v)
    return out, attn


if __name__ == "__main__":
    key = jax.random.PRNGKey(0)
    kq, kk, kv = jax.random.split(key, 3)

    B, Lq, Lk, Dh, Dv = 2, 8, 8, 32, 32
    q = jax.random.normal(kq, (B, Lq, Dh), dtype=jnp.float32)
    k = jax.random.normal(kk, (B, Lk, Dh), dtype=jnp.float32)
    v = jax.random.normal(kv, (B, Lk, Dv), dtype=jnp.float32)

    out, attn = scaled_dot_product_attention(q, k, v, d_h=Dh, drop_prob=0.0)
    jax.block_until_ready((out, attn))

    ref_out, ref_attn = _reference(q, k, v)
    assert out.shape == ref_out.shape and attn.shape == ref_attn.shape
    assert jnp.allclose(out, ref_out, atol=1e-5, rtol=1e-5), "output mismatch"
    assert jnp.allclose(attn, ref_attn, atol=1e-5, rtol=1e-5), "attn mismatch"

    print("KERNEL_OK")
</pallas_src>

<mosaic_0001>
module attributes {stable_mosaic.version = 11 : i64} {
  func.func @_sdpa_kernel(%arg0: i32, %arg1: i32, %arg2: memref<1x8x32xf32, #tpu.memory_space<vmem>>, %arg3: memref<1x8x32xf32, #tpu.memory_space<vmem>>, %arg4: memref<1x8x32xf32, #tpu.memory_space<vmem>>, %arg5: memref<1x8x32xf32, #tpu.memory_space<vmem>>, %arg6: memref<1x8x8xf32, #tpu.memory_space<vmem>>) attributes {dimension_semantics = [#tpu.dimension_semantics<parallel>, #tpu.dimension_semantics<arbitrary>], iteration_bounds = array<i64: 2, 1>, scalar_prefetch = 0 : i64, scratch_operands = 0 : i64, tpu.core_type = #tpu.core_type<tc>, window_params = [{transform_indices = @transform_0, window_bounds = array<i64: 1, 8, 32>}, {transform_indices = @transform_1, window_bounds = array<i64: 1, 8, 32>}, {transform_indices = @transform_2, window_bounds = array<i64: 1, 8, 32>}, {transform_indices = @transform_3, window_bounds = array<i64: 1, 8, 32>}, {transform_indices = @transform_4, window_bounds = array<i64: 1, 8, 8>}]} {
    %c0 = arith.constant 0 : index
    %c0_0 = arith.constant 0 : index
    %c0_1 = arith.constant 0 : index
    %0 = vector.load %arg2[%c0, %c0_0, %c0_1] : memref<1x8x32xf32, #tpu.memory_space<vmem>>, vector<1x8x32xf32>
    %1 = vector.shape_cast %0 : vector<1x8x32xf32> to vector<8x32xf32>
    %c0_2 = arith.constant 0 : index
    %c0_3 = arith.constant 0 : index
    %c0_4 = arith.constant 0 : index
    %2 = vector.load %arg3[%c0_2, %c0_3, %c0_4] : memref<1x8x32xf32, #tpu.memory_space<vmem>>, vector<1x8x32xf32>
    %3 = vector.shape_cast %2 : vector<1x8x32xf32> to vector<8x32xf32>
    %c0_5 = arith.constant 0 : index
    %c0_6 = arith.constant 0 : index
    %c0_7 = arith.constant 0 : index
    %4 = vector.load %arg4[%c0_5, %c0_6, %c0_7] : memref<1x8x32xf32, #tpu.memory_space<vmem>>, vector<1x8x32xf32>
    %5 = vector.shape_cast %4 : vector<1x8x32xf32> to vector<8x32xf32>
    %cst = arith.constant dense<0.000000e+00> : vector<8x8xf32>
    %6 = tpu.matmul %1, %3, %cst {dimension_numbers = #tpu.dot_dimension_numbers<[1], [1], [0], [0], [0, 0, 1, 0], [], []>} : vector<8x32xf32>, vector<8x32xf32>, vector<8x8xf32> -> vector<8x8xf32>
    %cst_8 = arith.constant dense<0xFF800000> : vector<8xf32>
    %7 = vector.multi_reduction <maximumf>, %6, %cst_8 [1] : vector<8x8xf32> to vector<8xf32>
    %8 = vector.shape_cast %7 : vector<8xf32> to vector<8x1xf32>
    %9 = vector.broadcast %8 : vector<8x1xf32> to vector<8x8xf32>
    %10 = arith.subf %6, %9 : vector<8x8xf32>
    %cst_9 = arith.constant 0.176776692 : f32
    %11 = vector.broadcast %cst_9 : f32 to vector<8x8xf32>
    %12 = arith.mulf %10, %11 : vector<8x8xf32>
    %13 = math.exp %12 : vector<8x8xf32>
    %cst_10 = arith.constant dense<0.000000e+00> : vector<8xf32>
    %14 = vector.multi_reduction <add>, %13, %cst_10 [1] : vector<8x8xf32> to vector<8xf32>
    %15 = vector.shape_cast %14 : vector<8xf32> to vector<8x1xf32>
    %16 = tpu.reciprocal %15 {approx = true} : vector<8x1xf32> -> vector<8x1xf32>
    %17 = arith.mulf %15, %16 : vector<8x1xf32>
    %cst_11 = arith.constant 2.000000e+00 : f32
    %18 = vector.broadcast %cst_11 : f32 to vector<8x1xf32>
    %19 = arith.subf %18, %17 : vector<8x1xf32>
    %20 = arith.mulf %16, %19 : vector<8x1xf32>
    %21 = vector.broadcast %20 : vector<8x1xf32> to vector<8x8xf32>
    %22 = arith.mulf %13, %21 : vector<8x8xf32>
    %cst_12 = arith.constant dense<0.000000e+00> : vector<8x32xf32>
    %23 = tpu.matmul %22, %5, %cst_12 {dimension_numbers = #tpu.dot_dimension_numbers<[1], [0], [0], [1], [0, 0, 1, 1], [], []>} : vector<8x8xf32>, vector<8x32xf32>, vector<8x32xf32> -> vector<8x32xf32>
    %c0_13 = arith.constant 0 : index
    %c0_14 = arith.constant 0 : index
    %c0_15 = arith.constant 0 : index
    %24 = vector.load %arg5[%c0_13, %c0_14, %c0_15] : memref<1x8x32xf32, #tpu.memory_space<vmem>>, vector<1x8x32xf32>
    %25 = vector.shape_cast %24 : vector<1x8x32xf32> to vector<8x32xf32>
    %26 = vector.shape_cast %23 : vector<8x32xf32> to vector<1x8x32xf32>
    tpu.vector_store %arg5[%c0_13, %c0_14, %c0_15], %26 {strides = array<i32>} : memref<1x8x32xf32, #tpu.memory_space<vmem>>, vector<1x8x32xf32>,
    %c0_16 = arith.constant 0 : index
    %c0_17 = arith.constant 0 : index
    %c0_18 = arith.constant 0 : index
    %27 = vector.load %arg6[%c0_16, %c0_17, %c0_18] : memref<1x8x8xf32, #tpu.memory_space<vmem>>, vector<1x8x8xf32>
    %28 = vector.shape_cast %27 : vector<1x8x8xf32> to vector<8x8xf32>
    %29 = vector.shape_cast %22 : vector<8x8xf32> to vector<1x8x8xf32>
    tpu.vector_store %arg6[%c0_16, %c0_17, %c0_18], %29 {strides = array<i32>} : memref<1x8x8xf32, #tpu.memory_space<vmem>>, vector<1x8x8xf32>,
    return
  }
  func.func @transform_0(%arg0: i32, %arg1: i32) -> (i32, i32, i32) {
    %c0_i32 = arith.constant 0 : i32
    %c0_i32_0 = arith.constant 0 : i32
    return %arg0, %arg1, %c0_i32 : i32, i32, i32
  }
  func.func @transform_1(%arg0: i32, %arg1: i32) -> (i32, i32, i32) {
    %c0_i32 = arith.constant 0 : i32
    %c0_i32_0 = arith.constant 0 : i32
    %c0_i32_1 = arith.constant 0 : i32
    return %arg0, %c0_i32, %c0_i32_0 : i32, i32, i32
  }
  func.func @transform_2(%arg0: i32, %arg1: i32) -> (i32, i32, i32) {
    %c0_i32 = arith.constant 0 : i32
    %c0_i32_0 = arith.constant 0 : i32
    %c0_i32_1 = arith.constant 0 : i32
    return %arg0, %c0_i32, %c0_i32_0 : i32, i32, i32
  }
  func.func @transform_3(%arg0: i32, %arg1: i32) -> (i32, i32, i32) {
    %c0_i32 = arith.constant 0 : i32
    %c0_i32_0 = arith.constant 0 : i32
    return %arg0, %arg1, %c0_i32 : i32, i32, i32
  }
  func.func @transform_4(%arg0: i32, %arg1: i32) -> (i32, i32, i32) {
    %c0_i32 = arith.constant 0 : i32
    %c0_i32_0 = arith.constant 0 : i32
    return %arg0, %arg1, %c0_i32 : i32, i32, i32
  }
}

</mosaic_0001>

<bundles_post_ra>
// kernel: tpu_custom_call.1
= control target key start
LH: loop header
LB: loop body
LE: loop exit
PB: predicated region body
PF: predicated region fallthrough
CT: control target
= control target key end

     0   :  { %s1106_s0 = inlined_call_operand.hbm [shape: f32[2,8,32], index: 0, kind: input, shape index: {}]   ;;  %s1107_s1 = inlined_call_operand.hbm [shape: f32[2,8,32], index: 1, kind: input, shape index: {}]   ;;  %s1108_s2 = inlined_call_operand.hbm [shape: f32[2,8,32], index: 2, kind: input, shape index: {}]   ;;  %s1109_s3 = inlined_call_operand.hbm [shape: f32[2,8,32], index: 3, kind: output, shape index: {0}]   ;;  %s1110_s4 = inlined_call_operand.hbm [shape: f32[2,8,8], index: 4, kind: output, shape index: {1}]  }
   0x1   :  { %1114 = sst [smem:[#allocation19_spill]] %s1107_s1 }
   0x2   :  { %10 = vsyncpa [#allocation3], 0 }
   0x3   :  { %12 = vsyncpa [#allocation3 + $0x1], 0 }
   0x4   :  { %13 = vsyncpa [#allocation6], 0 }
   0x5   :  { %15 = vsyncpa [#allocation6 + $0x1], 0 }
   0x6   :  { %16 = vsyncpa [#allocation4], 0 }
   0x7   :  { %18 = vsyncpa [#allocation4 + $0x1], 0 }
   0x8   :  { %19 = vsyncpa [#allocation10], 0 }
   0x9   :  { %21 = vsyncpa [#allocation10 + $0x1], 0  ;;  %s926_s15 = smov 0   ;;  %s928_s16 = smov 0  }
   0xa   :  { %s930_s17 = smov 0   ;;  %s932_s18 = smov 0  }
   0xb   :  { %s934_s19 = smov 0   ;;  %s936_s20 = smov 0  }
   0xc LB: > { %1115 = sst [smem:[#allocation15_spill]] %s887_s17  ;;  %s957_s21 = sadd.s32 4294967295, %s899_s20   ;;  %s899_s20 = sphi %s936_s20, %s27_s20   ;;  %s895_s19 = sphi %s934_s19, %s1129_s19   ;;  %s891_s18 = sphi %s932_s18, %s1128_s18   ;;  %s887_s17 = sphi %s930_s17, %s1127_s17   ;;  %s883_s16 = sphi %s928_s16, %s1131_s16   ;;  %s879_s15 = sphi %s926_s15, %s1130_s15  }
   0xd   : > { %1116 = sst [smem:[#allocation16_spill]] %s895_s19  ;;  %s586_s22 = sadd.s32 4294967294, %s899_s20  }
   0xe   : > { %s39_s23 = sadd.s32 1, %s895_s19  ;;  %s48_s24 = sadd.s32 1, %s887_s17 }
   0xf   : > { %p41_p0 = scmp.ge.s32.totalorder %s39_s23, 2  ;;  %p55_p1 = scmp.ne.s32.totalorder %s887_s17, %s883_s16 }
  0x10   : > { %p56_p2 = scmp.eq.s32.totalorder %s899_s20, 0  ;;  %p61_p3 = scmp.ne.s32.totalorder %s883_s16, %s879_s15 }
  0x11   : > { %s1133_s23 = smov (%p41_p0, %s39_s23), 0  ;;  %p62_p5 = scmp.eq.s32.totalorder %s957_s21, 0 }
  0x12   : > { %1117 = sst [smem:[#allocation17_spill]] %s1133_s23  ;;  %p969_p4 = por %p56_p2, %p55_p1 }
  0x13   : > { %s43_s26 = ssub.s32 %s895_s19, %s1133_s23  ;;  %p139_p6 = scmp.eq.s32.totalorder %s957_s21, 1 }
  0x14   : > { %p46_p7 = scmp.eq.s32.totalorder %s43_s26, 0  ;;  %p977_p8 = por %p62_p5, %p61_p3 }
  0x15   : > { %p981_p9 = por %p139_p6, %p55_p1  ;;  %p145_p10 = scmp.eq.s32.totalorder %s586_s22, 1 }
  0x16   : > { %s986_s29 = scalar_select %p46_p7, %s887_s17, %s48_s24  }
  0x17   : > { %p988_p11 = por %p145_p10, %p61_p3  ;;  %p588_p12 = scmp.ge.s32.totalorder %s899_s20, 2 }
  0x18   : > { %1121 = sst [smem:[#allocation18_spill]] %s986_s29  ;;  %p637_p13 = scmp.lt.s32.totalorder %s899_s20, 2 }
  0x19   : > { %s193_s5 = sand.u32 1, %s887_s17   ;;  %s590_s7 = sshll.u32 %s895_s19, 3 }
  0x1a   : > { %s589_s6 = sshll.u32 %s193_s5, 3  ;;  %p998_p0 = pnand %p637_p13, %p969_p4 }
  0x1b   : > { %s213_s9 = sand.u32 1, %s899_s20   ;;  %s1124_s1 = sld [smem:[#allocation19_spill]] }
  0x1c   : > { %s217_s14 = scalar_lea.vmem [#allocation5], %s589_s6  ;;  %s214_s24 = scalar_lea.sflag [#allocation6], %s213_s9 }
  0x1d   : > { %s225_s22 = sshll.u32 %s217_s14, 4  ;;  %p595_p1 = scmp.ge.s32.totalorder %s899_s20, 1  ;;  %s226_s22 = int_to_ptr.vmem [resolvable:$true] %s225_s22 }
  0x1e   : > { %p249_p2 = scmp.lt.s32.totalorder %s899_s20, 3  ;;  %s202_s10 = scalar_lea.hbm %s1106_s0, %s590_s7 }
  0x1f   : > { %s204_s11 = sshll.u32 %s202_s10, 4  ;;  %s194_s14 = scalar_lea.sflag [#allocation3], %s193_s5  ;;  %s205_s11 = int_to_ptr.hbm [resolvable:$true] %s204_s11 }
  0x20   : > { %p1010_p3 = pnand %p595_p1, %p249_p2  ;;  %s236_s29 = scalar_lea.vmem [#allocation7], %s589_s6 }
  0x21   : > { %s221_s12 = scalar_lea.hbm %s1124_s1, %s590_s7  ;;  %s244_s17 = sshll.u32 %s236_s29, 4  ;;  %s245_s17 = int_to_ptr.vmem [resolvable:$true] %s244_s17 }
  0x22   : > { %s223_s13 = sshll.u32 %s221_s12, 4  ;;  %s197_s12 = scalar_lea.vmem [#allocation2], %s589_s6  ;;  %s224_s13 = int_to_ptr.hbm [resolvable:$true] %s223_s13 }
  0x23   : > { %626 = dma.hbm_to_vmem [thread:$0]  (!%p998_p0), %s224_s13, 128, %s226_s22, %s214_s24  }
  0x24   : > { %s206_s1 = sshll.u32 %s197_s12, 4  ;;  %s240_s22 = scalar_lea.hbm %s1108_s2, %s590_s7  ;;  %s207_s1 = int_to_ptr.vmem [resolvable:$true] %s206_s1 }
  0x25   : > { %623 = dma.hbm_to_vmem [thread:$0]  (!%p998_p0), %s205_s11, 128, %s207_s1, %s194_s14  }
  0x26   : > { %s242_s19 = sshll.u32 %s240_s22, 4  ;;  %253 = sbr.rel (%p1010_p3) target bundleno = 568 (0x238), region = 32  ;;  %s243_s19 = int_to_ptr.hbm [resolvable:$true] %s242_s19 }
  0x27   : > { %629 = dma.hbm_to_vmem [thread:$0]  (!%p998_p0), %s243_s19, 128, %s245_s17, %s214_s24  }
  0x28   : > { %s1027_s23 = sand.u32 (!%p1010_p3), 1, %s883_s16  }
  0x29   : > { %s1030_s1 = sshll.u32 (!%p1010_p3), %s1027_s23, 3  ;;  %s256_s5 = scalar_lea.sflag (!%p1010_p3), [#allocation3], %s1027_s23 }
  0x2a   : > { %s259_s7 = scalar_lea.vmem (!%p1010_p3), [#allocation2], %s1030_s1 }
  0x2b   : > { %862 = dma.done.wait (%p977_p8), %s256_s5, 128  }
  0x2c   : > { %864 = vsyncadd (%p977_p8), %s256_s5, 4294967168  ;;  %s265_s17 = sand.u32 1, %s957_s21   ;;  %s269_s29 = scalar_lea.vmem [#allocation5], %s1030_s1 }
  0x2d   : > { %s266_s19 = scalar_lea.sflag [#allocation6], %s265_s17 }
  0x2e   : > { %866 = dma.done.wait (%p977_p8), %s266_s19, 256  }
  0x2f   : > { %868 = vsyncadd (%p977_p8), %s266_s19, 4294967040  ;;  %vm323_vm0 = vcmask 261120   ;;  %v321_v0 = vld [vmem:[%s269_s29] sm:$0xff]  ;;  %v320_v1 = vld [vmem:[%s259_s7] sm:$0xff]  ;;  %vm350_vm1 = vcmask 64512   ;;  %s279_s21 = scalar_lea.vmem [#allocation7], %s1030_s1 }
  0x30   : > { %601 = vmatpush.xpose.msk.msra.mxu0 %vm323_vm0, %v321_v0  ;;  %v322_v10 = vld [vmem:[%s279_s21] sm:$0xff]  ;;  %s606_s27 = sshll.u32 %s891_s18, 3  ;;  %s319_s25 = scalar_lea.vmem [#allocation9], %s1030_s1 }
  0x31   : > { %384 = vmatpush.msra.mxu1 %v322_v10  ;;  %s423_s24 = scalar_lea.hbm %s1110_s4, %s606_s27  ;;  %s425_s26 = sshll.u32 %s319_s25, 4  ;;  %s426_s26 = int_to_ptr.vmem [resolvable:$true] %s425_s26 }
  0x32   : > { %s427_s10 = sshll.u32 %s423_s24, 4  ;;  %s397_s11 = scalar_lea.sflag [#allocation10], %s1027_s23  ;;  %s428_s10 = int_to_ptr.hbm [resolvable:$true] %s427_s10 }
  0x33   : > { %602 = vmatmul.msk.f32.vlgmr.msra.gmra.mxu0 %vm323_vm0, %v320_v1  ;;  %s795_s12 = sshra.s32 %s428_s10, 4  ;;  %s801_s13 = scalar_lea.hbm %s1110_s4, 16  ;;  %s796_s12 = int_to_ptr.hbm [resolvable:$true] %s795_s12 }
  0x34   : > { %s797_s18 = scalar_lea.hbm %s796_s12, 8  ;;  %p802_p7 = scmp.lt.s32.totalorder %s796_s12, %s1110_s4 }
  0x35   : > { %p798_p4 = scmp.ne.s32.totalorder %s796_s12, %s797_s18  ;;  %p803_p8 = scmp.lt.s32.totalorder %s801_s13, %s797_s18 }
  0x37   : > { %p799_p5 = pnand %p798_p4, %p981_p9  ;;  %p804_p10 = por %p803_p8, %p802_p7 }
  0x39   : > { %p800_p6 = pneg %p799_p5 }
  0x3b   : > { %p805_p13 = pnand %p804_p10, %p800_p6 }
  0xb0   : > { %v347_v2 = vpop.f32.mrf.mxu0 }
  0xb1   : > { %v351_v3 = vsel %vm350_vm1, %v347_v2, -inf }
  0xb2   : > { %352 = vmax.xlane.f32.xlu0 %v351_v3 }
 0x125   : > { %v353_v4 = vpop.xlane.xlu0 %352 }
 0x126   : > { %v354_v5 = vsub.f32 %v347_v2, %v353_v4 }
 0x128   : > { %v355_v6 = vmul.f32 0.17677669, %v354_v5 }
 0x12a   : > { %v356_v7 = vmul.f32 1.442695, %v355_v6 }
 0x12c   : > { %687 = vpow2.f32 %v356_v7 }
 0x132   : > { %v688_v8 = vpop.eup %687 }
 0x133   : > { %v358_v9 = vsel %vm350_vm1, %v688_v8, 0.0 }
 0x134   : > { %359 = vadd.xlane.f32.xlu0 %v358_v9 }
 0x1a7   : > { %v360_v11 = vpop.xlane.xlu0 %359 }
 0x1a8   : > { %689 = vrcp.f32 %v360_v11 }
 0x1ae   : > { %v690_v12 = vpop.eup %689 }
 0x1af   : > { %v362_v13 = vmul.f32 %v690_v12, %v360_v11 }
 0x1b1   : > { %v363_v14 = vsub.f32 2.0, %v362_v13 }
 0x1b3   : > { %v364_v15 = vmul.f32 %v690_v12, %v363_v14 }
 0x1b5   : > { %v365_v16 = vmul.f32 %v688_v8, %v364_v15 }
 0x1b7   : > { %603 = vmatmul.msk.f32.vlgmr.msra.gmra.mxu1 %vm350_vm1, %v365_v16  ;;  %390 = vst.msk [vmem:[%s319_s25] sm:$0xff] %vm350_vm1, %v365_v16 }
 0x1b8   : > { %808 = shalt.err (!%p805_p13)
}
 0x1b9   : > { %617 = dma.vmem_to_hbm [thread:$0]  (%p981_p9), %s426_s26, 128, %s428_s10, %s397_s11  }
 0x1ba   : > { %s408_s19 = scalar_lea.hbm %s1109_s3, %s606_s27  ;;  %s312_s29 = scalar_lea.vmem [#allocation8], %s1030_s1 }
 0x1bb   : > { %s410_s21 = sshll.u32 %s312_s29, 4  ;;  %s412_s6 = sshll.u32 %s408_s19, 4  ;;  %s411_s21 = int_to_ptr.vmem [resolvable:$true] %s410_s21  ;;  %s413_s6 = int_to_ptr.hbm [resolvable:$true] %s412_s6 }
 0x1bc   : > { %s392_s8 = scalar_lea.sflag [#allocation4], %s1027_s23  ;;  %s823_s24 = sshra.s32 %s413_s6, 4  ;;  %s824_s24 = int_to_ptr.hbm [resolvable:$true] %s823_s24 }
 0x1bd   : > { %s825_s25 = scalar_lea.hbm %s824_s24, 8  ;;  %s829_s27 = scalar_lea.hbm %s1109_s3, 16 }
 0x1be   : > { %p826_p0 = scmp.ne.s32.totalorder %s824_s24, %s825_s25  ;;  %p830_p3 = scmp.lt.s32.totalorder %s824_s24, %s1109_s3 }
 0x1bf   : > { %p831_p4 = scmp.lt.s32.totalorder %s829_s27, %s825_s25 }
 0x1c0   : > { %p827_p1 = pnand %p826_p0, %p981_p9 }
 0x1c1   : > { %p832_p5 = por %p831_p4, %p830_p3 }
 0x1c2   : > { %p828_p2 = pneg %p827_p1 }
 0x1c4   : > { %p833_p6 = pnand %p832_p5, %p828_p2 }
 0x234   : > { %v386_v17 = vpop.f32.mrf.mxu1 }
 0x235   : > { %389 = vst.msk [vmem:[%s312_s29] sm:$0xff] %vm323_vm0, %v386_v17 }
 0x236   : > { %836 = shalt.err (!%p833_p6)
}
 0x237   : > { %616 = dma.vmem_to_hbm [thread:$0]  (%p981_p9), %s411_s21, 128, %s413_s6, %s392_s8  }
 0x238 PF: > { %s439_s23 = sand.u32 1, %s879_s15   ;;  %p631_p7 = pnand %p588_p12, %p988_p11 }
 0x239   : > { %s440_s12 = scalar_lea.sflag [#allocation4], %s439_s23 }
 0x23a   : > { %p632_p8 = pneg %p631_p7 }
 0x23c   : > { %870 = dma.done.wait (%p632_p8), %s440_s12, 128  }
 0x23d   : > { %872 = vsyncadd (%p632_p8), %s440_s12, 4294967168  ;;  %s450_s18 = scalar_lea.sflag [#allocation10], %s439_s23 }
 0x23e   : > { %874 = dma.done.wait (%p632_p8), %s450_s18, 128  }
 0x23f   : > { %876 = vsyncadd (%p632_p8), %s450_s18, 4294967168  ;;  %s27_s20 = sadd.s32 1, %s899_s20   ;;  %s1126_s28 = sld [smem:[#allocation15_spill]] }
 0x240   : > { %p24_p10 = scmp.ge.s32.totalorder %s27_s20, 4   ;;  %s1127_s17 = sld [smem:[#allocation18_spill]] }
 0x241   : > { %s1128_s18 = sld [smem:[#allocation16_spill]]  ;;  %s1130_s15 = smov %s883_s16 }
 0x242   : > { %s1129_s19 = sld [smem:[#allocation17_spill]]  ;;  %26 = sbr.rel (!%p24_p10) target bundleno = 12 (0xc), region = 118 }
 0x245   : > { %s1131_s16 = smov %s1126_s28 }
 0x247   :  { %456 = vsyncpa [#allocation3], 1 }
 0x248   :  { %458 = vsyncpa [#allocation3 + $0x1], 1 }
 0x249   :  { %459 = vsyncpa [#allocation6], 1 }
 0x24a   :  { %461 = vsyncpa [#allocation6 + $0x1], 1 }
 0x24b   :  { %462 = vsyncpa [#allocation4], 1 }
 0x24c   :  { %464 = vsyncpa [#allocation4 + $0x1], 1 }
 0x24d   :  { %465 = vsyncpa [#allocation10], 1 }
 0x24e   :  { %467 = vsyncpa [#allocation10 + $0x1], 1 }

</bundles_post_ra>
